<compile_context>
chip_gen: v7x
topology: tpu7x:2x2x1
jax: 0.10.0
libtpu: 0.0.40
codegen_flags: <defaults>
</compile_context>

<pallas_src>
import math

import jax
import jax.numpy as jnp
from jax import lax
from jax.experimental import pallas as pl
from jax.experimental.pallas import tpu as pltpu


# ----------------------- SE3 kernel synthesis (plain-JAX parameter glue) -------
def gaussian_radial_basis(size, sigma=0.6):
    """Radial part of se3cnn's gaussian_window_wrapper for l=0 filters."""
    c = (size - 1) / 2.0
    g = jnp.arange(size, dtype=jnp.float32) - c
    zz, yy, xx = jnp.meshgrid(g, g, g, indexing="ij")
    r = jnp.sqrt(xx ** 2 + yy ** 2 + zz ** 2)                      # (k,k,k)
    radii = jnp.arange(0, size // 2 + 1, dtype=jnp.float32)        # (R,)
    basis = jnp.exp(-0.5 * ((r[None] - radii[:, None, None, None]) / sigma) ** 2)
    norm = jnp.sqrt(jnp.sum(basis ** 2, axis=(1, 2, 3), keepdims=True))
    basis = basis / norm
    return basis * (1.0 / (2.0 * math.sqrt(math.pi)))              # (R,k,k,k)


def se3_scalar_kernel(key, mult_in, mult_out, size):
    """SE3Kernel for Rs_in=[(mult_in,0)], Rs_out=[(mult_out,0)]."""
    # TODO(synk): only l=0 <-> l=0 paths implemented; general Clebsch-Gordan coupling /
    # higher-order spherical harmonics of SE3Kernel are not reproduced.
    basis = gaussian_radial_basis(size)                            # (R,k,k,k)
    n_radial = basis.shape[0]
    w = jax.random.normal(key, (mult_out, mult_in, n_radial), jnp.float32)
    w = w / math.sqrt(mult_in * n_radial)                          # path normalization
    return jnp.einsum("oir,rxyz->oixyz", w, basis)                 # (Cout,Cin,k,k,k)


def _round_up(a, b):
    return (a + b - 1) // b * b


# ----------------------- Pallas conv3d kernel ----------------------------------
def _make_conv_kernel(tap_offsets, cin_pad, s_tile, l_pad):
    """One grid step = one (batch n, flat-spatial tile t) output block."""

    def kernel(x_hbm, w_ref, o_ref, xslab, xcol, sem):
        n = pl.program_id(0)
        t = pl.program_id(1)
        n_tiles = pl.num_programs(1)
        slot = t % 2

        def slab_copy(tile_idx, slot_idx):
            q0 = pl.multiple_of(tile_idx * s_tile, s_tile)
            return pltpu.make_async_copy(
                x_hbm.at[n, :, pl.ds(q0, l_pad)],   # haloed slab, stays in HBM otherwise
                xslab.at[slot_idx],
                sem.at[slot_idx])

        # Prime the double buffer once per batch element (tile axis is "arbitrary",
        # so this is megacore-safe: cores are only split along the batch axis).
        @pl.when(t == 0)
        def _():
            slab_copy(t, slot).start()

        slab_copy(t, slot).wait()

        # Prefetch the next tile of the same batch element while we compute.
        @pl.when(t + 1 < n_tiles)
        def _():
            slab_copy(t + 1, 1 - slot).start()

        # In-VMEM im2col: every tap is a constant flat shift of the slab.  Stores are
        # sublane-tile aligned (cin_pad == packing tile), so they lower to plain vst.
        xs = xslab.at[slot]
        for j, off in enumerate(tap_offsets):          # static, fully unrolled
            xcol[pl.ds(j * cin_pad, cin_pad), :] = xs[:, pl.ds(off, s_tile)]

        # Single fused MXU matmul, K = T * cin_pad, bf16 x bf16 -> f32 accumulate.
        # No reduction grid axis => exactly one output store per tile.
        o_ref[0] = jnp.dot(w_ref[...], xcol[...],
                           preferred_element_type=jnp.float32)

    return kernel


def conv3d_pallas(x, weight, *, block_s=512, compute_dtype=jnp.bfloat16):
    """'Valid' (padding=0), stride-1 3D convolution == torch conv3d defaults."""
    N, Cin, D, H, W = x.shape
    Cout, Cin_w, k, k2, k3 = weight.shape
    assert Cin == Cin_w and k == k2 == k3
    assert block_s % 128 == 0, "output tile must be lane-dense (multiple of 128)"
    Do, Ho, Wo = D - k + 1, H - k + 1, W - k + 1
    T = k * k * k
    HW = H * W

    # Flat-spatial view q = d*H*W + h*W + w: tap (kd,kh,kw) becomes a constant offset.
    tap_offsets = [kd * HW + kh * W + kw
                   for kd in range(k) for kh in range(k) for kw in range(k)]
    halo = tap_offsets[-1]

    sub = 16 if compute_dtype == jnp.bfloat16 else 8      # sublane packing tile
    cin_pad = _round_up(Cin, sub)
    cout_pad = _round_up(Cout, 8)

    s_tile = block_s
    q_valid = Do * HW                                     # flat range we must produce
    n_tiles = pl.cdiv(q_valid, s_tile)
    q_pad = n_tiles * s_tile
    l_pad = _round_up(s_tile + halo, 128)                 # haloed slab length
    qx = q_pad + l_pad                                    # padded flat extent of x
    k_tot = T * cin_pad                                   # fused contraction length

    # Layout plumbing in plain JAX: ~1x copy of x (NOT a k^3 im2col), zero padding so
    # halo reads and padded channels are well-defined zeros.
    x_flat = x.reshape(N, Cin, D * HW).astype(compute_dtype)
    x_flat = jnp.pad(x_flat, ((0, 0), (0, cin_pad - Cin), (0, qx - D * HW)))

    w2 = weight.reshape(Cout, Cin, T).transpose(0, 2, 1)           # (Cout, T, Cin)
    w2 = jnp.pad(w2, ((0, cout_pad - Cout), (0, 0), (0, cin_pad - Cin)))
    w2 = w2.reshape(cout_pad, k_tot).astype(compute_dtype)         # (Cout_pad, K)

    # VMEM budget check — conservative bound that also fits v7x (64 MiB physical,
    # ~32 MiB scoped default).  Shrink block_s if this trips at large shapes.
    itemsize = jnp.dtype(compute_dtype).itemsize
    vmem_bytes = (2 * cin_pad * l_pad * itemsize          # double-buffered halo slab
                  + k_tot * s_tile * itemsize             # im2col scratch
                  + 2 * cout_pad * k_tot * itemsize       # resident weight block
                  + 2 * cout_pad * s_tile * 4)            # pipelined f32 output block
    assert vmem_bytes < 24 * 1024 * 1024, "reduce block_s: VMEM budget (v7x-safe)"

    kernel = _make_conv_kernel(tap_offsets, cin_pad, s_tile, l_pad)

    out_flat = pl.pallas_call(
        kernel,
        out_shape=jax.ShapeDtypeStruct((N, cout_pad, q_pad), jnp.float32),
        grid_spec=pltpu.PrefetchScalarGridSpec(
            num_scalar_prefetch=0,
            grid=(N, n_tiles),
            in_specs=[
                pl.BlockSpec(memory_space=pl.ANY),                     # x stays in HBM
                pl.BlockSpec((cout_pad, k_tot), lambda n, t: (0, 0)),  # resident weight
            ],
            out_specs=pl.BlockSpec((1, cout_pad, s_tile), lambda n, t: (n, 0, t)),
            scratch_shapes=[
                pltpu.VMEM((2, cin_pad, l_pad), compute_dtype),  # halo slab (x2 buffers)
                pltpu.VMEM((k_tot, s_tile), compute_dtype),      # im2col matrix
                pltpu.SemaphoreType.DMA((2,)),
            ],
        ),
        compiler_params=pltpu.CompilerParams(
            dimension_semantics=("parallel", "arbitrary")),
    )(x_flat, w2)

    # Drop channel/flat padding; discard wrap-around (invalid h/w) positions.
    out = out_flat[:, :Cout, :q_valid].reshape(N, Cout, Do, H, W)
    return out[:, :, :, :Ho, :Wo]


# ----------------------- Module wrapper -----------------------------------------
class SE3Convolution:
    def __init__(self, key, Rs_in, Rs_out, size, **kwargs):
        (mult_in, l_in), = Rs_in
        (mult_out, l_out), = Rs_out
        assert l_in == 0 and l_out == 0, "only scalar irreps supported here"
        self.weight_kernel = se3_scalar_kernel(key, mult_in, mult_out, size)
        self.kwargs = kwargs

    def __call__(self, x, *, block_s=512):
        # torch.nn.functional.conv3d(input, self.kernel(), **self.kwargs)
        assert not self.kwargs, "only default conv3d kwargs implemented"
        return conv3d_pallas(x, self.weight_kernel, block_s=block_s)


if __name__ == "__main__":
    key = jax.random.PRNGKey(0)
    key_x, key_w = jax.random.split(key)

    Rs_in, Rs_out, size = [(4, 0)], [(8, 0)], 3
    N, Cin, D, H, W = 2, 4, 8, 8, 8

    x = jax.random.normal(key_x, (N, Cin, D, H, W), jnp.float32)
    conv = SE3Convolution(key_w, Rs_in, Rs_out, size)

    out = jax.block_until_ready(conv(x, block_s=256))   # 2 spatial tiles per batch

    # Reference on the same bf16-rounded operands (the kernel uses bf16 MXU inputs
    # with f32 accumulation), f32-accurate XLA conv.
    xr = x.astype(jnp.bfloat16).astype(jnp.float32)
    wr = conv.weight_kernel.astype(jnp.bfloat16).astype(jnp.float32)
    ref = lax.conv_general_dilated(
        xr, wr, window_strides=(1, 1, 1), padding="VALID",
        dimension_numbers=("NCDHW", "OIDHW", "NCDHW"),
        precision=lax.Precision.HIGHEST)

    assert out.shape == (N, 8, D - size + 1, H - size + 1, W - size + 1)
    assert jnp.allclose(out, ref, rtol=1e-2, atol=1e-2)

    print("KERNEL_OK")
</pallas_src>

<mosaic_0001>
module attributes {stable_mosaic.version = 11 : i64} {
  func.func @kernel(%arg0: i32, %arg1: i32, %arg2: memref<2x16x1024xbf16, #tpu.memory_space<any>>, %arg3: memref<8x432xbf16, #tpu.memory_space<vmem>>, %arg4: memref<1x8x256xf32, #tpu.memory_space<vmem>>, %arg5: memref<2x16x512xbf16, #tpu.memory_space<vmem>>, %arg6: memref<432x256xbf16, #tpu.memory_space<vmem>>, %arg7: memref<2x!tpu.dma_semaphore, #tpu.memory_space<semaphore_mem>>) attributes {dimension_semantics = [#tpu.dimension_semantics<parallel>, #tpu.dimension_semantics<arbitrary>], iteration_bounds = array<i64: 2, 2>, scalar_prefetch = 0 : i64, scratch_operands = 3 : i64, tpu.core_type = #tpu.core_type<tc>, window_params = [{}, {pipeline_mode = #tpu.pipeline_mode<synchronous>, transform_indices = @transform_1, window_bounds = array<i64: 8, 432>}, {transform_indices = @transform_2, window_bounds = array<i64: 1, 8, 256>}]} {
    %c2_i32 = arith.constant 2 : i32
    %c0_i32 = arith.constant 0 : i32
    %0 = arith.cmpi eq, %c2_i32, %c0_i32 : i32
    %c1_i32 = arith.constant 1 : i32
    %1 = arith.select %0, %c1_i32, %c2_i32 : i32
    %2 = arith.remsi %arg1, %1 : i32
    %c0_i32_0 = arith.constant 0 : i32
    %3 = arith.cmpi ne, %2, %c0_i32_0 : i32
    %c0_i32_1 = arith.constant 0 : i32
    %4 = arith.cmpi slt, %2, %c0_i32_1 : i32
    %c0_i32_2 = arith.constant 0 : i32
    %5 = arith.cmpi slt, %1, %c0_i32_2 : i32
    %6 = arith.xori %4, %5 : i1
    %7 = arith.andi %6, %3 : i1
    %8 = arith.addi %2, %1 : i32
    %9 = arith.select %7, %8, %2 : i32
    %c0_i32_3 = arith.constant 0 : i32
    %10 = arith.cmpi eq, %arg1, %c0_i32_3 : i32
    %11 = arith.extui %10 : i1 to i32
    %c0_i32_4 = arith.constant 0 : i32
    %12 = arith.cmpi ne, %11, %c0_i32_4 : i32
    scf.if %12 {
      %c256_i32_132 = arith.constant 256 : i32
      %139 = arith.muli %arg1, %c256_i32_132 : i32
      %140 = tpu.assume_multiple %139, 256 : i32
      %c0_i32_133 = arith.constant 0 : i32
      %141 = tpu.memref_slice %arg2[%arg0, %c0_i32_133, %140] : memref<2x16x1024xbf16, #tpu.memory_space<any>> -> memref<1x16x512xbf16, #tpu.memory_space<any>>
      %142 = tpu.memref_squeeze %141 : memref<1x16x512xbf16, #tpu.memory_space<any>> -> memref<16x512xbf16, #tpu.memory_space<any>>
      %c0_i32_134 = arith.constant 0 : i32
      %c0_i32_135 = arith.constant 0 : i32
      %143 = tpu.memref_slice %arg5[%9, %c0_i32_134, %c0_i32_135] : memref<2x16x512xbf16, #tpu.memory_space<vmem>> -> memref<1x16x512xbf16, #tpu.memory_space<vmem>>
      %144 = tpu.memref_squeeze %143 : memref<1x16x512xbf16, #tpu.memory_space<vmem>> -> memref<16x512xbf16, #tpu.memory_space<vmem>>
      %145 = tpu.memref_slice %arg7[%9] : memref<2x!tpu.dma_semaphore, #tpu.memory_space<semaphore_mem>> -> memref<1x!tpu.dma_semaphore, #tpu.memory_space<semaphore_mem>>
      %146 = tpu.memref_squeeze %145 : memref<1x!tpu.dma_semaphore, #tpu.memory_space<semaphore_mem>> -> memref<!tpu.dma_semaphore, #tpu.memory_space<semaphore_mem>>
      tpu.enqueue_dma source(%142 : memref<16x512xbf16, #tpu.memory_space<any>>) target(%144 : memref<16x512xbf16, #tpu.memory_space<vmem>>) target_semaphore(%146 : memref<!tpu.dma_semaphore, #tpu.memory_space<semaphore_mem>>)
    } else {
    }
    %c256_i32 = arith.constant 256 : i32
    %13 = arith.muli %arg1, %c256_i32 : i32
    %14 = tpu.assume_multiple %13, 256 : i32
    %c0_i32_5 = arith.constant 0 : i32
    %15 = tpu.memref_slice %arg2[%arg0, %c0_i32_5, %14] : memref<2x16x1024xbf16, #tpu.memory_space<any>> -> memref<1x16x512xbf16, #tpu.memory_space<any>>
    %16 = tpu.memref_squeeze %15 : memref<1x16x512xbf16, #tpu.memory_space<any>> -> memref<16x512xbf16, #tpu.memory_space<any>>
    %c0_i32_6 = arith.constant 0 : i32
    %c0_i32_7 = arith.constant 0 : i32
    %17 = tpu.memref_slice %arg5[%9, %c0_i32_6, %c0_i32_7] : memref<2x16x512xbf16, #tpu.memory_space<vmem>> -> memref<1x16x512xbf16, #tpu.memory_space<vmem>>
    %18 = tpu.memref_squeeze %17 : memref<1x16x512xbf16, #tpu.memory_space<vmem>> -> memref<16x512xbf16, #tpu.memory_space<vmem>>
    %19 = tpu.memref_slice %arg7[%9] : memref<2x!tpu.dma_semaphore, #tpu.memory_space<semaphore_mem>> -> memref<1x!tpu.dma_semaphore, #tpu.memory_space<semaphore_mem>>
    %20 = tpu.memref_squeeze %19 : memref<1x!tpu.dma_semaphore, #tpu.memory_space<semaphore_mem>> -> memref<!tpu.dma_semaphore, #tpu.memory_space<semaphore_mem>>
    tpu.wait_dma2 semaphore(%20 : memref<!tpu.dma_semaphore, #tpu.memory_space<semaphore_mem>>) src(%16 : memref<16x512xbf16, #tpu.memory_space<any>>) dst(%18 : memref<16x512xbf16, #tpu.memory_space<vmem>>)
    %c1_i32_8 = arith.constant 1 : i32
    %21 = arith.addi %arg1, %c1_i32_8 : i32
    %c2_i32_9 = arith.constant 2 : i32
    %22 = arith.cmpi slt, %21, %c2_i32_9 : i32
    %23 = arith.extui %22 : i1 to i32
    %c0_i32_10 = arith.constant 0 : i32
    %24 = arith.cmpi ne, %23, %c0_i32_10 : i32
    scf.if %24 {
      %c1_i32_132 = arith.constant 1 : i32
      %139 = arith.addi %arg1, %c1_i32_132 : i32
      %c1_i32_133 = arith.constant 1 : i32
      %140 = arith.subi %c1_i32_133, %9 : i32
      %c256_i32_134 = arith.constant 256 : i32
      %141 = arith.muli %139, %c256_i32_134 : i32
      %142 = tpu.assume_multiple %141, 256 : i32
      %c0_i32_135 = arith.constant 0 : i32
      %143 = tpu.memref_slice %arg2[%arg0, %c0_i32_135, %142] : memref<2x16x1024xbf16, #tpu.memory_space<any>> -> memref<1x16x512xbf16, #tpu.memory_space<any>>
      %144 = tpu.memref_squeeze %143 : memref<1x16x512xbf16, #tpu.memory_space<any>> -> memref<16x512xbf16, #tpu.memory_space<any>>
      %c0_i32_136 = arith.constant 0 : i32
      %c0_i32_137 = arith.constant 0 : i32
      %145 = tpu.memref_slice %arg5[%140, %c0_i32_136, %c0_i32_137] : memref<2x16x512xbf16, #tpu.memory_space<vmem>> -> memref<1x16x512xbf16, #tpu.memory_space<vmem>>
      %146 = tpu.memref_squeeze %145 : memref<1x16x512xbf16, #tpu.memory_space<vmem>> -> memref<16x512xbf16, #tpu.memory_space<vmem>>
      %147 = tpu.memref_slice %arg7[%140] : memref<2x!tpu.dma_semaphore, #tpu.memory_space<semaphore_mem>> -> memref<1x!tpu.dma_semaphore, #tpu.memory_space<semaphore_mem>>
      %148 = tpu.memref_squeeze %147 : memref<1x!tpu.dma_semaphore, #tpu.memory_space<semaphore_mem>> -> memref<!tpu.dma_semaphore, #tpu.memory_space<semaphore_mem>>
      tpu.enqueue_dma source(%144 : memref<16x512xbf16, #tpu.memory_space<any>>) target(%146 : memref<16x512xbf16, #tpu.memory_space<vmem>>) target_semaphore(%148 : memref<!tpu.dma_semaphore, #tpu.memory_space<semaphore_mem>>)
    } else {
    }
    %c0_i32_11 = arith.constant 0 : i32
    %c0_i32_12 = arith.constant 0 : i32
    %25 = tpu.memref_slice %arg5[%9, %c0_i32_11, %c0_i32_12] : memref<2x16x512xbf16, #tpu.memory_space<vmem>> -> memref<1x16x512xbf16, #tpu.memory_space<vmem>>
    %26 = tpu.memref_squeeze %25 : memref<1x16x512xbf16, #tpu.memory_space<vmem>> -> memref<16x512xbf16, #tpu.memory_space<vmem>>
    %c0 = arith.constant 0 : index
    %c0_13 = arith.constant 0 : index
    %27 = vector.load %26[%c0, %c0_13] : memref<16x512xbf16, #tpu.memory_space<vmem>>, vector<16x256xbf16>
    %c0_14 = arith.constant 0 : index
    %c0_15 = arith.constant 0 : index
    %28 = vector.load %arg6[%c0_14, %c0_15] : memref<432x256xbf16, #tpu.memory_space<vmem>>, vector<16x256xbf16>
    tpu.vector_store %arg6[%c0_14, %c0_15], %27 {strides = array<i32>} : memref<432x256xbf16, #tpu.memory_space<vmem>>, vector<16x256xbf16>,
    %c0_i32_16 = arith.constant 0 : i32
    %c0_i32_17 = arith.constant 0 : i32
    %29 = tpu.memref_slice %arg5[%9, %c0_i32_16, %c0_i32_17] : memref<2x16x512xbf16, #tpu.memory_space<vmem>> -> memref<1x16x512xbf16, #tpu.memory_space<vmem>>
    %30 = tpu.memref_squeeze %29 : memref<1x16x512xbf16, #tpu.memory_space<vmem>> -> memref<16x512xbf16, #tpu.memory_space<vmem>>
    %c0_18 = arith.constant 0 : index
    %c1 = arith.constant 1 : index
    %31 = vector.load %30[%c0_18, %c1] : memref<16x512xbf16, #tpu.memory_space<vmem>>, vector<16x256xbf16>
    %c16 = arith.constant 16 : index
    %c0_19 = arith.constant 0 : index
    %32 = vector.load %arg6[%c16, %c0_19] : memref<432x256xbf16, #tpu.memory_space<vmem>>, vector<16x256xbf16>
    tpu.vector_store %arg6[%c16, %c0_19], %31 {strides = array<i32>} : memref<432x256xbf16, #tpu.memory_space<vmem>>, vector<16x256xbf16>,
    %c0_i32_20 = arith.constant 0 : i32
    %c0_i32_21 = arith.constant 0 : i32
    %33 = tpu.memref_slice %arg5[%9, %c0_i32_20, %c0_i32_21] : memref<2x16x512xbf16, #tpu.memory_space<vmem>> -> memref<1x16x512xbf16, #tpu.memory_space<vmem>>
    %34 = tpu.memref_squeeze %33 : memref<1x16x512xbf16, #tpu.memory_space<vmem>> -> memref<16x512xbf16, #tpu.memory_space<vmem>>
    %c0_22 = arith.constant 0 : index
    %c2 = arith.constant 2 : index
    %35 = vector.load %34[%c0_22, %c2] : memref<16x512xbf16, #tpu.memory_space<vmem>>, vector<16x256xbf16>
    %c32 = arith.constant 32 : index
    %c0_23 = arith.constant 0 : index
    %36 = vector.load %arg6[%c32, %c0_23] : memref<432x256xbf16, #tpu.memory_space<vmem>>, vector<16x256xbf16>
    tpu.vector_store %arg6[%c32, %c0_23], %35 {strides = array<i32>} : memref<432x256xbf16, #tpu.memory_space<vmem>>, vector<16x256xbf16>,
    %c0_i32_24 = arith.constant 0 : i32
    %c0_i32_25 = arith.constant 0 : i32
    %37 = tpu.memref_slice %arg5[%9, %c0_i32_24, %c0_i32_25] : memref<2x16x512xbf16, #tpu.memory_space<vmem>> -> memref<1x16x512xbf16, #tpu.memory_space<vmem>>
    %38 = tpu.memref_squeeze %37 : memref<1x16x512xbf16, #tpu.memory_space<vmem>> -> memref<16x512xbf16, #tpu.memory_space<vmem>>
    %c0_26 = arith.constant 0 : index
    %c8 = arith.constant 8 : index
    %39 = vector.load %38[%c0_26, %c8] : memref<16x512xbf16, #tpu.memory_space<vmem>>, vector<16x256xbf16>
    %c48 = arith.constant 48 : index
    %c0_27 = arith.constant 0 : index
    %40 = vector.load %arg6[%c48, %c0_27] : memref<432x256xbf16, #tpu.memory_space<vmem>>, vector<16x256xbf16>
    tpu.vector_store %arg6[%c48, %c0_27], %39 {strides = array<i32>} : memref<432x256xbf16, #tpu.memory_space<vmem>>, vector<16x256xbf16>,
    %c0_i32_28 = arith.constant 0 : i32
    %c0_i32_29 = arith.constant 0 : i32
    %41 = tpu.memref_slice %arg5[%9, %c0_i32_28, %c0_i32_29] : memref<2x16x512xbf16, #tpu.memory_space<vmem>> -> memref<1x16x512xbf16, #tpu.memory_space<vmem>>
    %42 = tpu.memref_squeeze %41 : memref<1x16x512xbf16, #tpu.memory_space<vmem>> -> memref<16x512xbf16, #tpu.memory_space<vmem>>
    %c0_30 = arith.constant 0 : index
    %c9 = arith.constant 9 : index
    %43 = vector.load %42[%c0_30, %c9] : memref<16x512xbf16, #tpu.memory_space<vmem>>, vector<16x256xbf16>
    %c64 = arith.constant 64 : index
    %c0_31 = arith.constant 0 : index
    %44 = vector.load %arg6[%c64, %c0_31] : memref<432x256xbf16, #tpu.memory_space<vmem>>, vector<16x256xbf16>
    tpu.vector_store %arg6[%c64, %c0_31], %43 {strides = array<i32>} : memref<432x256xbf16, #tpu.memory_space<vmem>>, vector<16x256xbf16>,
    %c0_i32_32 = arith.constant 0 : i32
    %c0_i32_33 = arith.constant 0 : i32
    %45 = tpu.memref_slice %arg5[%9, %c0_i32_32, %c0_i32_33] : memref<2x16x512xbf16, #tpu.memory_space<vmem>> -> memref<1x16x512xbf16, #tpu.memory_space<vmem>>
    %46 = tpu.memref_squeeze %45 : memref<1x16x512xbf16, #tpu.memory_space<vmem>> -> memref<16x512xbf16, #tpu.memory_space<vmem>>
    %c0_34 = arith.constant 0 : index
    %c10 = arith.constant 10 : index
    %47 = vector.load %46[%c0_34, %c10] : memref<16x512xbf16, #tpu.memory_space<vmem>>, vector<16x256xbf16>
    %c80 = arith.constant 80 : index
    %c0_35 = arith.constant 0 : index
    %48 = vector.load %arg6[%c80, %c0_35] : memref<432x256xbf16, #tpu.memory_space<vmem>>, vector<16x256xbf16>
    tpu.vector_store %arg6[%c80, %c0_35], %47 {strides = array<i32>} : memref<432x256xbf16, #tpu.memory_space<vmem>>, vector<16x256xbf16>,
    %c0_i32_36 = arith.constant 0 : i32
    %c0_i32_37 = arith.constant 0 : i32
    %49 = tpu.memref_slice %arg5[%9, %c0_i32_36, %c0_i32_37] : memref<2x16x512xbf16, #tpu.memory_space<vmem>> -> memref<1x16x512xbf16, #tpu.memory_space<vmem>>
    %50 = tpu.memref_squeeze %49 : memref<1x16x512xbf16, #tpu.memory_space<vmem>> -> memref<16x512xbf16, #tpu.memory_space<vmem>>
    %c0_38 = arith.constant 0 : index
    %c16_39 = arith.constant 16 : index
    %51 = vector.load %50[%c0_38, %c16_39] : memref<16x512xbf16, #tpu.memory_space<vmem>>, vector<16x256xbf16>
    %c96 = arith.constant 96 : index
    %c0_40 = arith.constant 0 : index
    %52 = vector.load %arg6[%c96, %c0_40] : memref<432x256xbf16, #tpu.memory_space<vmem>>, vector<16x256xbf16>
    tpu.vector_store %arg6[%c96, %c0_40], %51 {strides = array<i32>} : memref<432x256xbf16, #tpu.memory_space<vmem>>, vector<16x256xbf16>,
    %c0_i32_41 = arith.constant 0 : i32
    %c0_i32_42 = arith.constant 0 : i32
    %53 = tpu.memref_slice %arg5[%9, %c0_i32_41, %c0_i32_42] : memref<2x16x512xbf16, #tpu.memory_space<vmem>> -> memref<1x16x512xbf16, #tpu.memory_space<vmem>>
    %54 = tpu.memref_squeeze %53 : memref<1x16x512xbf16, #tpu.memory_space<vmem>> -> memref<16x512xbf16, #tpu.memory_space<vmem>>
    %c0_43 = arith.constant 0 : index
    %c17 = arith.constant 17 : index
    %55 = vector.load %54[%c0_43, %c17] : memref<16x512xbf16, #tpu.memory_space<vmem>>, vector<16x256xbf16>
    %c112 = arith.constant 112 : index
    %c0_44 = arith.constant 0 : index
    %56 = vector.load %arg6[%c112, %c0_44] : memref<432x256xbf16, #tpu.memory_space<vmem>>, vector<16x256xbf16>
    tpu.vector_store %arg6[%c112, %c0_44], %55 {strides = array<i32>} : memref<432x256xbf16, #tpu.memory_space<vmem>>, vector<16x256xbf16>,
    %c0_i32_45 = arith.constant 0 : i32
    %c0_i32_46 = arith.constant 0 : i32
    %57 = tpu.memref_slice %arg5[%9, %c0_i32_45, %c0_i32_46] : memref<2x16x512xbf16, #tpu.memory_space<vmem>> -> memref<1x16x512xbf16, #tpu.memory_space<vmem>>
    %58 = tpu.memref_squeeze %57 : memref<1x16x512xbf16, #tpu.memory_space<vmem>> -> memref<16x512xbf16, #tpu.memory_space<vmem>>
    %c0_47 = arith.constant 0 : index
    %c18 = arith.constant 18 : index
    %59 = vector.load %58[%c0_47, %c18] : memref<16x512xbf16, #tpu.memory_space<vmem>>, vector<16x256xbf16>
    %c128 = arith.constant 128 : index
    %c0_48 = arith.constant 0 : index
    %60 = vector.load %arg6[%c128, %c0_48] : memref<432x256xbf16, #tpu.memory_space<vmem>>, vector<16x256xbf16>
    tpu.vector_store %arg6[%c128, %c0_48], %59 {strides = array<i32>} : memref<432x256xbf16, #tpu.memory_space<vmem>>, vector<16x256xbf16>,
    %c0_i32_49 = arith.constant 0 : i32
    %c0_i32_50 = arith.constant 0 : i32
    %61 = tpu.memref_slice %arg5[%9, %c0_i32_49, %c0_i32_50] : memref<2x16x512xbf16, #tpu.memory_space<vmem>> -> memref<1x16x512xbf16, #tpu.memory_space<vmem>>
    %62 = tpu.memref_squeeze %61 : memref<1x16x512xbf16, #tpu.memory_space<vmem>> -> memref<16x512xbf16, #tpu.memory_space<vmem>>
    %c0_51 = arith.constant 0 : index
    %c64_52 = arith.constant 64 : index
    %63 = vector.load %62[%c0_51, %c64_52] : memref<16x512xbf16, #tpu.memory_space<vmem>>, vector<16x256xbf16>
    %c144 = arith.constant 144 : index
    %c0_53 = arith.constant 0 : index
    %64 = vector.load %arg6[%c144, %c0_53] : memref<432x256xbf16, #tpu.memory_space<vmem>>, vector<16x256xbf16>
    tpu.vector_store %arg6[%c144, %c0_53], %63 {strides = array<i32>} : memref<432x256xbf16, #tpu.memory_space<vmem>>, vector<16x256xbf16>,
    %c0_i32_54 = arith.constant 0 : i32
    %c0_i32_55 = arith.constant 0 : i32
    %65 = tpu.memref_slice %arg5[%9, %c0_i32_54, %c0_i32_55] : memref<2x16x512xbf16, #tpu.memory_space<vmem>> -> memref<1x16x512xbf16, #tpu.memory_space<vmem>>
    %66 = tpu.memref_squeeze %65 : memref<1x16x512xbf16, #tpu.memory_space<vmem>> -> memref<16x512xbf16, #tpu.memory_space<vmem>>
    %c0_56 = arith.constant 0 : index
    %c65 = arith.constant 65 : index
    %67 = vector.load %66[%c0_56, %c65] : memref<16x512xbf16, #tpu.memory_space<vmem>>, vector<16x256xbf16>
    %c160 = arith.constant 160 : index
    %c0_57 = arith.constant 0 : index
    %68 = vector.load %arg6[%c160, %c0_57] : memref<432x256xbf16, #tpu.memory_space<vmem>>, vector<16x256xbf16>
    tpu.vector_store %arg6[%c160, %c0_57], %67 {strides = array<i32>} : memref<432x256xbf16, #tpu.memory_space<vmem>>, vector<16x256xbf16>,
    %c0_i32_58 = arith.constant 0 : i32
    %c0_i32_59 = arith.constant 0 : i32
    %69 = tpu.memref_slice %arg5[%9, %c0_i32_58, %c0_i32_59] : memref<2x16x512xbf16, #tpu.memory_space<vmem>> -> memref<1x16x512xbf16, #tpu.memory_space<vmem>>
    %70 = tpu.memref_squeeze %69 : memref<1x16x512xbf16, #tpu.memory_space<vmem>> -> memref<16x512xbf16, #tpu.memory_space<vmem>>
    %c0_60 = arith.constant 0 : index
    %c66 = arith.constant 66 : index
    %71 = vector.load %70[%c0_60, %c66] : memref<16x512xbf16, #tpu.memory_space<vmem>>, vector<16x256xbf16>
    %c176 = arith.constant 176 : index
    %c0_61 = arith.constant 0 : index
    %72 = vector.load %arg6[%c176, %c0_61] : memref<432x256xbf16, #tpu.memory_space<vmem>>, vector<16x256xbf16>
    tpu.vector_store %arg6[%c176, %c0_61], %71 {strides = array<i32>} : memref<432x256xbf16, #tpu.memory_space<vmem>>, vector<16x256xbf16>,
    %c0_i32_62 = arith.constant 0 : i32
    %c0_i32_63 = arith.constant 0 : i32
    %73 = tpu.memref_slice %arg5[%9, %c0_i32_62, %c0_i32_63] : memref<2x16x512xbf16, #tpu.memory_space<vmem>> -> memref<1x16x512xbf16, #tpu.memory_space<vmem>>
    %74 = tpu.memref_squeeze %73 : memref<1x16x512xbf16, #tpu.memory_space<vmem>> -> memref<16x512xbf16, #tpu.memory_space<vmem>>
    %c0_64 = arith.constant 0 : index
    %c72 = arith.constant 72 : index
    %75 = vector.load %74[%c0_64, %c72] : memref<16x512xbf16, #tpu.memory_space<vmem>>, vector<16x256xbf16>
    %c192 = arith.constant 192 : index
    %c0_65 = arith.constant 0 : index
    %76 = vector.load %arg6[%c192, %c0_65] : memref<432x256xbf16, #tpu.memory_space<vmem>>, vector<16x256xbf16>
    tpu.vector_store %arg6[%c192, %c0_65], %75 {strides = array<i32>} : memref<432x256xbf16, #tpu.memory_space<vmem>>, vector<16x256xbf16>,
    %c0_i32_66 = arith.constant 0 : i32
    %c0_i32_67 = arith.constant 0 : i32
    %77 = tpu.memref_slice %arg5[%9, %c0_i32_66, %c0_i32_67] : memref<2x16x512xbf16, #tpu.memory_space<vmem>> -> memref<1x16x512xbf16, #tpu.memory_space<vmem>>
    %78 = tpu.memref_squeeze %77 : memref<1x16x512xbf16, #tpu.memory_space<vmem>> -> memref<16x512xbf16, #tpu.memory_space<vmem>>
    %c0_68 = arith.constant 0 : index
    %c73 = arith.constant 73 : index
    %79 = vector.load %78[%c0_68, %c73] : memref<16x512xbf16, #tpu.memory_space<vmem>>, vector<16x256xbf16>
    %c208 = arith.constant 208 : index
    %c0_69 = arith.constant 0 : index
    %80 = vector.load %arg6[%c208, %c0_69] : memref<432x256xbf16, #tpu.memory_space<vmem>>, vector<16x256xbf16>
    tpu.vector_store %arg6[%c208, %c0_69], %79 {strides = array<i32>} : memref<432x256xbf16, #tpu.memory_space<vmem>>, vector<16x256xbf16>,
    %c0_i32_70 = arith.constant 0 : i32
    %c0_i32_71 = arith.constant 0 : i32
    %81 = tpu.memref_slice %arg5[%9, %c0_i32_70, %c0_i32_71] : memref<2x16x512xbf16, #tpu.memory_space<vmem>> -> memref<1x16x512xbf16, #tpu.memory_space<vmem>>
    %82 = tpu.memref_squeeze %81 : memref<1x16x512xbf16, #tpu.memory_space<vmem>> -> memref<16x512xbf16, #tpu.memory_space<vmem>>
    %c0_72 = arith.constant 0 : index
    %c74 = arith.constant 74 : index
    %83 = vector.load %82[%c0_72, %c74] : memref<16x512xbf16, #tpu.memory_space<vmem>>, vector<16x256xbf16>
    %c224 = arith.constant 224 : index
    %c0_73 = arith.constant 0 : index
    %84 = vector.load %arg6[%c224, %c0_73] : memref<432x256xbf16, #tpu.memory_space<vmem>>, vector<16x256xbf16>
    tpu.vector_store %arg6[%c224, %c0_73], %83 {strides = array<i32>} : memref<432x256xbf16, #tpu.memory_space<vmem>>, vector<16x256xbf16>,
    %c0_i32_74 = arith.constant 0 : i32
    %c0_i32_75 = arith.constant 0 : i32
    %85 = tpu.memref_slice %arg5[%9, %c0_i32_74, %c0_i32_75] : memref<2x16x512xbf16, #tpu.memory_space<vmem>> -> memref<1x16x512xbf16, #tpu.memory_space<vmem>>
    %86 = tpu.memref_squeeze %85 : memref<1x16x512xbf16, #tpu.memory_space<vmem>> -> memref<16x512xbf16, #tpu.memory_space<vmem>>
    %c0_76 = arith.constant 0 : index
    %c80_77 = arith.constant 80 : index
    %87 = vector.load %86[%c0_76, %c80_77] : memref<16x512xbf16, #tpu.memory_space<vmem>>, vector<16x256xbf16>
    %c240 = arith.constant 240 : index
    %c0_78 = arith.constant 0 : index
    %88 = vector.load %arg6[%c240, %c0_78] : memref<432x256xbf16, #tpu.memory_space<vmem>>, vector<16x256xbf16>
    tpu.vector_store %arg6[%c240, %c0_78], %87 {strides = array<i32>} : memref<432x256xbf16, #tpu.memory_space<vmem>>, vector<16x256xbf16>,
    %c0_i32_79 = arith.constant 0 : i32
    %c0_i32_80 = arith.constant 0 : i32
    %89 = tpu.memref_slice %arg5[%9, %c0_i32_79, %c0_i32_80] : memref<2x16x512xbf16, #tpu.memory_space<vmem>> -> memref<1x16x512xbf16, #tpu.memory_space<vmem>>
    %90 = tpu.memref_squeeze %89 : memref<1x16x512xbf16, #tpu.memory_space<vmem>> -> memref<16x512xbf16, #tpu.memory_space<vmem>>
    %c0_81 = arith.constant 0 : index
    %c81 = arith.constant 81 : index
    %91 = vector.load %90[%c0_81, %c81] : memref<16x512xbf16, #tpu.memory_space<vmem>>, vector<16x256xbf16>
    %c256 = arith.constant 256 : index
    %c0_82 = arith.constant 0 : index
    %92 = vector.load %arg6[%c256, %c0_82] : memref<432x256xbf16, #tpu.memory_space<vmem>>, vector<16x256xbf16>
    tpu.vector_store %arg6[%c256, %c0_82], %91 {strides = array<i32>} : memref<432x256xbf16, #tpu.memory_space<vmem>>, vector<16x256xbf16>,
    %c0_i32_83 = arith.constant 0 : i32
    %c0_i32_84 = arith.constant 0 : i32
    %93 = tpu.memref_slice %arg5[%9, %c0_i32_83, %c0_i32_84] : memref<2x16x512xbf16, #tpu.memory_space<vmem>> -> memref<1x16x512xbf16, #tpu.memory_space<vmem>>
    %94 = tpu.memref_squeeze %93 : memref<1x16x512xbf16, #tpu.memory_space<vmem>> -> memref<16x512xbf16, #tpu.memory_space<vmem>>
    %c0_85 = arith.constant 0 : index
    %c82 = arith.constant 82 : index
    %95 = vector.load %94[%c0_85, %c82] : memref<16x512xbf16, #tpu.memory_space<vmem>>, vector<16x256xbf16>
    %c272 = arith.constant 272 : index
    %c0_86 = arith.constant 0 : index
    %96 = vector.load %arg6[%c272, %c0_86] : memref<432x256xbf16, #tpu.memory_space<vmem>>, vector<16x256xbf16>
    tpu.vector_store %arg6[%c272, %c0_86], %95 {strides = array<i32>} : memref<432x256xbf16, #tpu.memory_space<vmem>>, vector<16x256xbf16>,
    %c0_i32_87 = arith.constant 0 : i32
    %c0_i32_88 = arith.constant 0 : i32
    %97 = tpu.memref_slice %arg5[%9, %c0_i32_87, %c0_i32_88] : memref<2x16x512xbf16, #tpu.memory_space<vmem>> -> memref<1x16x512xbf16, #tpu.memory_space<vmem>>
    %98 = tpu.memref_squeeze %97 : memref<1x16x512xbf16, #tpu.memory_space<vmem>> -> memref<16x512xbf16, #tpu.memory_space<vmem>>
    %c0_89 = arith.constant 0 : index
    %c128_90 = arith.constant 128 : index
    %99 = vector.load %98[%c0_89, %c128_90] : memref<16x512xbf16, #tpu.memory_space<vmem>>, vector<16x256xbf16>
    %c288 = arith.constant 288 : index
    %c0_91 = arith.constant 0 : index
    %100 = vector.load %arg6[%c288, %c0_91] : memref<432x256xbf16, #tpu.memory_space<vmem>>, vector<16x256xbf16>
    tpu.vector_store %arg6[%c288, %c0_91], %99 {strides = array<i32>} : memref<432x256xbf16, #tpu.memory_space<vmem>>, vector<16x256xbf16>,
    %c0_i32_92 = arith.constant 0 : i32
    %c0_i32_93 = arith.constant 0 : i32
    %101 = tpu.memref_slice %arg5[%9, %c0_i32_92, %c0_i32_93] : memref<2x16x512xbf16, #tpu.memory_space<vmem>> -> memref<1x16x512xbf16, #tpu.memory_space<vmem>>
    %102 = tpu.memref_squeeze %101 : memref<1x16x512xbf16, #tpu.memory_space<vmem>> -> memref<16x512xbf16, #tpu.memory_space<vmem>>
    %c0_94 = arith.constant 0 : index
    %c129 = arith.constant 129 : index
    %103 = vector.load %102[%c0_94, %c129] : memref<16x512xbf16, #tpu.memory_space<vmem>>, vector<16x256xbf16>
    %c304 = arith.constant 304 : index
    %c0_95 = arith.constant 0 : index
    %104 = vector.load %arg6[%c304, %c0_95] : memref<432x256xbf16, #tpu.memory_space<vmem>>, vector<16x256xbf16>
    tpu.vector_store %arg6[%c304, %c0_95], %103 {strides = array<i32>} : memref<432x256xbf16, #tpu.memory_space<vmem>>, vector<16x256xbf16>,
    %c0_i32_96 = arith.constant 0 : i32
    %c0_i32_97 = arith.constant 0 : i32
    %105 = tpu.memref_slice %arg5[%9, %c0_i32_96, %c0_i32_97] : memref<2x16x512xbf16, #tpu.memory_space<vmem>> -> memref<1x16x512xbf16, #tpu.memory_space<vmem>>
    %106 = tpu.memref_squeeze %105 : memref<1x16x512xbf16, #tpu.memory_space<vmem>> -> memref<16x512xbf16, #tpu.memory_space<vmem>>
    %c0_98 = arith.constant 0 : index
    %c130 = arith.constant 130 : index
    %107 = vector.load %106[%c0_98, %c130] : memref<16x512xbf16, #tpu.memory_space<vmem>>, vector<16x256xbf16>
    %c320 = arith.constant 320 : index
    %c0_99 = arith.constant 0 : index
    %108 = vector.load %arg6[%c320, %c0_99] : memref<432x256xbf16, #tpu.memory_space<vmem>>, vector<16x256xbf16>
    tpu.vector_store %arg6[%c320, %c0_99], %107 {strides = array<i32>} : memref<432x256xbf16, #tpu.memory_space<vmem>>, vector<16x256xbf16>,
    %c0_i32_100 = arith.constant 0 : i32
    %c0_i32_101 = arith.constant 0 : i32
    %109 = tpu.memref_slice %arg5[%9, %c0_i32_100, %c0_i32_101] : memref<2x16x512xbf16, #tpu.memory_space<vmem>> -> memref<1x16x512xbf16, #tpu.memory_space<vmem>>
    %110 = tpu.memref_squeeze %109 : memref<1x16x512xbf16, #tpu.memory_space<vmem>> -> memref<16x512xbf16, #tpu.memory_space<vmem>>
    %c0_102 = arith.constant 0 : index
    %c136 = arith.constant 136 : index
    %111 = vector.load %110[%c0_102, %c136] : memref<16x512xbf16, #tpu.memory_space<vmem>>, vector<16x256xbf16>
    %c336 = arith.constant 336 : index
    %c0_103 = arith.constant 0 : index
    %112 = vector.load %arg6[%c336, %c0_103] : memref<432x256xbf16, #tpu.memory_space<vmem>>, vector<16x256xbf16>
    tpu.vector_store %arg6[%c336, %c0_103], %111 {strides = array<i32>} : memref<432x256xbf16, #tpu.memory_space<vmem>>, vector<16x256xbf16>,
    %c0_i32_104 = arith.constant 0 : i32
    %c0_i32_105 = arith.constant 0 : i32
    %113 = tpu.memref_slice %arg5[%9, %c0_i32_104, %c0_i32_105] : memref<2x16x512xbf16, #tpu.memory_space<vmem>> -> memref<1x16x512xbf16, #tpu.memory_space<vmem>>
    %114 = tpu.memref_squeeze %113 : memref<1x16x512xbf16, #tpu.memory_space<vmem>> -> memref<16x512xbf16, #tpu.memory_space<vmem>>
    %c0_106 = arith.constant 0 : index
    %c137 = arith.constant 137 : index
    %115 = vector.load %114[%c0_106, %c137] : memref<16x512xbf16, #tpu.memory_space<vmem>>, vector<16x256xbf16>
    %c352 = arith.constant 352 : index
    %c0_107 = arith.constant 0 : index
    %116 = vector.load %arg6[%c352, %c0_107] : memref<432x256xbf16, #tpu.memory_space<vmem>>, vector<16x256xbf16>
    tpu.vector_store %arg6[%c352, %c0_107], %115 {strides = array<i32>} : memref<432x256xbf16, #tpu.memory_space<vmem>>, vector<16x256xbf16>,
    %c0_i32_108 = arith.constant 0 : i32
    %c0_i32_109 = arith.constant 0 : i32
    %117 = tpu.memref_slice %arg5[%9, %c0_i32_108, %c0_i32_109] : memref<2x16x512xbf16, #tpu.memory_space<vmem>> -> memref<1x16x512xbf16, #tpu.memory_space<vmem>>
    %118 = tpu.memref_squeeze %117 : memref<1x16x512xbf16, #tpu.memory_space<vmem>> -> memref<16x512xbf16, #tpu.memory_space<vmem>>
    %c0_110 = arith.constant 0 : index
    %c138 = arith.constant 138 : index
    %119 = vector.load %118[%c0_110, %c138] : memref<16x512xbf16, #tpu.memory_space<vmem>>, vector<16x256xbf16>
    %c368 = arith.constant 368 : index
    %c0_111 = arith.constant 0 : index
    %120 = vector.load %arg6[%c368, %c0_111] : memref<432x256xbf16, #tpu.memory_space<vmem>>, vector<16x256xbf16>
    tpu.vector_store %arg6[%c368, %c0_111], %119 {strides = array<i32>} : memref<432x256xbf16, #tpu.memory_space<vmem>>, vector<16x256xbf16>,
    %c0_i32_112 = arith.constant 0 : i32
    %c0_i32_113 = arith.constant 0 : i32
    %121 = tpu.memref_slice %arg5[%9, %c0_i32_112, %c0_i32_113] : memref<2x16x512xbf16, #tpu.memory_space<vmem>> -> memref<1x16x512xbf16, #tpu.memory_space<vmem>>
    %122 = tpu.memref_squeeze %121 : memref<1x16x512xbf16, #tpu.memory_space<vmem>> -> memref<16x512xbf16, #tpu.memory_space<vmem>>
    %c0_114 = arith.constant 0 : index
    %c144_115 = arith.constant 144 : index
    %123 = vector.load %122[%c0_114, %c144_115] : memref<16x512xbf16, #tpu.memory_space<vmem>>, vector<16x256xbf16>
    %c384 = arith.constant 384 : index
    %c0_116 = arith.constant 0 : index
    %124 = vector.load %arg6[%c384, %c0_116] : memref<432x256xbf16, #tpu.memory_space<vmem>>, vector<16x256xbf16>
    tpu.vector_store %arg6[%c384, %c0_116], %123 {strides = array<i32>} : memref<432x256xbf16, #tpu.memory_space<vmem>>, vector<16x256xbf16>,
    %c0_i32_117 = arith.constant 0 : i32
    %c0_i32_118 = arith.constant 0 : i32
    %125 = tpu.memref_slice %arg5[%9, %c0_i32_117, %c0_i32_118] : memref<2x16x512xbf16, #tpu.memory_space<vmem>> -> memref<1x16x512xbf16, #tpu.memory_space<vmem>>
    %126 = tpu.memref_squeeze %125 : memref<1x16x512xbf16, #tpu.memory_space<vmem>> -> memref<16x512xbf16, #tpu.memory_space<vmem>>
    %c0_119 = arith.constant 0 : index
    %c145 = arith.constant 145 : index
    %127 = vector.load %126[%c0_119, %c145] : memref<16x512xbf16, #tpu.memory_space<vmem>>, vector<16x256xbf16>
    %c400 = arith.constant 400 : index
    %c0_120 = arith.constant 0 : index
    %128 = vector.load %arg6[%c400, %c0_120] : memref<432x256xbf16, #tpu.memory_space<vmem>>, vector<16x256xbf16>
    tpu.vector_store %arg6[%c400, %c0_120], %127 {strides = array<i32>} : memref<432x256xbf16, #tpu.memory_space<vmem>>, vector<16x256xbf16>,
    %c0_i32_121 = arith.constant 0 : i32
    %c0_i32_122 = arith.constant 0 : i32
    %129 = tpu.memref_slice %arg5[%9, %c0_i32_121, %c0_i32_122] : memref<2x16x512xbf16, #tpu.memory_space<vmem>> -> memref<1x16x512xbf16, #tpu.memory_space<vmem>>
    %130 = tpu.memref_squeeze %129 : memref<1x16x512xbf16, #tpu.memory_space<vmem>> -> memref<16x512xbf16, #tpu.memory_space<vmem>>
    %c0_123 = arith.constant 0 : index
    %c146 = arith.constant 146 : index
    %131 = vector.load %130[%c0_123, %c146] : memref<16x512xbf16, #tpu.memory_space<vmem>>, vector<16x256xbf16>
    %c416 = arith.constant 416 : index
    %c0_124 = arith.constant 0 : index
    %132 = vector.load %arg6[%c416, %c0_124] : memref<432x256xbf16, #tpu.memory_space<vmem>>, vector<16x256xbf16>
    tpu.vector_store %arg6[%c416, %c0_124], %131 {strides = array<i32>} : memref<432x256xbf16, #tpu.memory_space<vmem>>, vector<16x256xbf16>,
    %c0_125 = arith.constant 0 : index
    %c0_126 = arith.constant 0 : index
    %133 = vector.load %arg3[%c0_125, %c0_126] : memref<8x432xbf16, #tpu.memory_space<vmem>>, vector<8x432xbf16>
    %c0_127 = arith.constant 0 : index
    %c0_128 = arith.constant 0 : index
    %134 = vector.load %arg6[%c0_127, %c0_128] : memref<432x256xbf16, #tpu.memory_space<vmem>>, vector<432x256xbf16>
    %cst = arith.constant dense<0.000000e+00> : vector<8x256xf32>
    %135 = tpu.matmul %133, %134, %cst {dimension_numbers = #tpu.dot_dimension_numbers<[1], [0], [0], [1], [0, 0, 1, 1], [], []>} : vector<8x432xbf16>, vector<432x256xbf16>, vector<8x256xf32> -> vector<8x256xf32>
    %c0_129 = arith.constant 0 : index
    %c0_130 = arith.constant 0 : index
    %c0_131 = arith.constant 0 : index
    %136 = vector.load %arg4[%c0_129, %c0_130, %c0_131] : memref<1x8x256xf32, #tpu.memory_space<vmem>>, vector<1x8x256xf32>
    %137 = vector.shape_cast %136 : vector<1x8x256xf32> to vector<8x256xf32>
    %138 = vector.shape_cast %135 : vector<8x256xf32> to vector<1x8x256xf32>
    tpu.vector_store %arg4[%c0_129, %c0_130, %c0_131], %138 {strides = array<i32>} : memref<1x8x256xf32, #tpu.memory_space<vmem>>, vector<1x8x256xf32>,
    return
  }
  func.func @transform_1(%arg0: i32, %arg1: i32) -> (i32, i32) {
    %c0_i32 = arith.constant 0 : i32
    %c0_i32_0 = arith.constant 0 : i32
    %c0_i32_1 = arith.constant 0 : i32
    return %c0_i32, %c0_i32_0 : i32, i32
  }
  func.func @transform_2(%arg0: i32, %arg1: i32) -> (i32, i32, i32) {
    %c0_i32 = arith.constant 0 : i32
    %c0_i32_0 = arith.constant 0 : i32
    return %arg0, %c0_i32, %arg1 : i32, i32, i32
  }
}

</mosaic_0001>

<bundles_post_ra>
// kernel: tpu_custom_call.1
= control target key start
LH: loop header
LB: loop body
LE: loop exit
PB: predicated region body
PF: predicated region fallthrough
CT: control target
= control target key end

     0   :  { %s1775_s0 = inlined_call_operand.hbm [shape: bf16[2,16,1024], index: 0, kind: input, shape index: {}]   ;;  %s1776_s1 = inlined_call_operand.hbm [shape: bf16[8,432], index: 1, kind: input, shape index: {}]   ;;  %s1777_s2 = inlined_call_operand.hbm [shape: f32[2,8,512], index: 2, kind: output, shape index: {}]  }
   0x1   :  { %1788 = sst [smem:[#allocation21_spill]] %s1776_s1 }
   0x2   :  { %7 = vsyncpa [#allocation6], 0 }
   0x3   :  { %8 = vsyncpa [#allocation7], 0 }
   0x4   :  { %10 = vsyncpa [#allocation7 + $0x1], 0  ;;  %s1347_s9 = smov 0   ;;  %s1349_s10 = smov 0  }
   0x5   :  { %s1351_s11 = smov 0   ;;  %s1353_s12 = smov 0  }
   0x6   :  { %s1355_s13 = smov 0   ;;  %s1357_s14 = smov 0  }
   0x7   :  { %s1359_s15 = smov 0   ;;  %s1361_s16 = smov 0  }
   0x8 LB: > { %1789 = sst [smem:[#allocation18_spill]] %s1295_s15  ;;  %s988_s17 = sadd.s32 4294967295, %s1299_s16   ;;  %s1299_s16 = sphi %s1361_s16, %s16_s16   ;;  %s1295_s15 = sphi %s1359_s15, %s1808_s15   ;;  %s1291_s14 = sphi %s1357_s14, %s1813_s14   ;;  %s1287_s13 = sphi %s1355_s13, %s1806_s13   ;;  %s1283_s12 = sphi %s1353_s12, %s1812_s12   ;;  %s1279_s11 = sphi %s1351_s11, %s1811_s11   ;;  %s1275_s10 = sphi %s1349_s10, %s1810_s10   ;;  %s1271_s9 = sphi %s1347_s9, %s1809_s9  }
   0x9   : > { %s989_s18 = sadd.s32 4294967294, %s1299_s16   ;;  %s25_s19 = sadd.s32 1, %s1291_s14 }
   0xa   : > { %s28_s20 = sadd.s32 1, %s1295_s15  ;;  %p26_p0 = scmp.ge.s32.totalorder %s25_s19, 2 }
   0xb   : > { %s58_s21 = sadd.s32 1, %s1279_s11  ;;  %p68_p1 = scmp.ne.s32.totalorder %s1279_s11, %s1275_s10 }
   0xc   : > { %p69_p2 = scmp.eq.s32.totalorder %s988_s17, 3  ;;  %s1815_s19 = smov (%p26_p0, %s25_s19), 0 }
   0xd   : > { %1790 = sst [smem:[#allocation19_spill]] %s1815_s19  ;;  %s1817_s20 = smov (!%p26_p0, %s28_s20), %s1295_s15 }
   0xe   : > { %s54_s22 = ssub.s32 %s1291_s14, %s1815_s19  ;;  %p1399_p3 = por %p69_p2, %p68_p1 }
   0xf   : > { %p30_p4 = scmp.ge.s32.totalorder %s1817_s20, 2  ;;  %p74_p5 = scmp.ne.s32.totalorder %s1275_s10, %s1271_s9 }
  0x10   : > { %s1791_s23 = scalar_select %p1399_p3, 1, 0 }
  0x11   : > { %p75_p6 = scmp.eq.s32.totalorder %s989_s18, 3  ;;  %p990_p7 = scmp.ge.s32.totalorder %s1299_s16, 1 }
  0x12   : > { %s1819_s20 = smov (%p30_p4, %s1817_s20), 0  ;;  %p82_p9 = scmp.lt.s32.totalorder %s1299_s16, 5 }
  0x13   : > { %1792 = sst [smem:[#allocation20_spill]] %s1819_s20  ;;  %p1408_p8 = por %p75_p6, %p74_p5 }
  0x14   : > { %s53_s25 = ssub.s32 %s1295_s15, %s1819_s20  ;;  %p1415_p10 = pnand %p990_p7, %p82_p9 }
  0x15   : > { %s1793_s24 = scalar_select %p1408_p8, 1, 0 }
  0x16   : > { %s55_s26 = sor.u32 %s54_s22, %s53_s25  ;;  %p1419_p12 = scmp.eq.s32.totalorder %s988_s17, 0 }
  0x17   : > { %s1794_s27 = scalar_select %p1415_p10, 1, 0 }
  0x18   : > { %p56_p11 = scmp.eq.s32.totalorder %s55_s26, 0  ;;  %p1060_p13 = pneg %p1415_p10 }
  0x19   : > { %s1795_s28 = scalar_select %p1419_p12, 1, 0 }
  0x1a   : > { %s1426_s29 = scalar_select %p56_p11, %s1279_s11, %s58_s21  }
  0x1b   : > { %s1301_s30 = smov [#allocation5]   ;;  %p1430_p0 = pnand %p1419_p12, %p1060_p13 }
  0x1c   : > { %s95_s3 = sshll.u32 %s1301_s30, 4  ;;  %s1797_s1 = sld [smem:[#allocation21_spill]]  ;;  %s96_s3 = int_to_ptr.vmem [resolvable:$true] %s95_s3 }
  0x1d   : > { %p1173_p2 = pneg %p1430_p0 }
  0x22   : > { %s1171_s7 = scalar_lea.hbm %s1797_s1, 256 }
  0x23   : > { %p1172_p1 = scmp.ne.s32.totalorder %s1797_s1, %s1171_s7  ;;  %p1178_p6 = scmp.lt.u32.totalorder %s1171_s7, %s1797_s1 }
  0x25   : > { %p1174_p4 = pnand %p1173_p2, %p1172_p1 }
  0x27   : > { %p1175_p5 = pneg %p1174_p4 }
  0x29   : > { %p1180_p7 = pnand %p1178_p6, %p1175_p5 }
  0x2b   : > { %1183 = shalt.err (!%p1180_p7)
}
  0x2c   : > { %s1184_s22 = scalar_lea.vmem %s96_s3, 256  ;;  %p1192_p8 = scmp.lt.s32.totalorder %s96_s3, %s96_s3 }
  0x2d   : > { %p1185_p9 = scmp.ne.s32.totalorder %s96_s3, %s1184_s22  ;;  %p1193_p3 = scmp.lt.s32.totalorder %s1184_s22, %s1184_s22 }
  0x2f   : > { %p1187_p11 = pnand %p1185_p9, %p1173_p2  ;;  %p1194_p12 = por %p1193_p3, %p1192_p8 }
  0x31   : > { %p1188_p13 = pneg %p1187_p11 }
  0x33   : > { %p1195_p10 = pnand %p1194_p12, %p1188_p13 }
  0x35   : > { %1198 = shalt.err (!%p1195_p10)
}
  0x36   : > { %1063 = dma.hbm_to_vmem [thread:$0]  (!%p1430_p0), %s1797_s1, 256, %s96_s3, [#allocation6]  }
  0x37   : > { %p1798_p1 = scmp.ne.s32.totalorder %s1794_s27, 0 }
  0x38   : > { %p1799_p4 = scmp.ne.s32.totalorder (!%p1798_p1), %s1795_s28, 0 }
  0x39   : > { %108 = sbr.rel (%p1798_p1) target bundleno = 607 (0x25f), region = 24 }
  0x40   : > { %1260 = dma.done.wait (%p1799_p4), [#allocation6], 256  }
  0x41   : > { %1262 = vsyncadd (%p1799_p4), [#allocation6], 4294967040  ;;  %s1782_s30 = sand.u32 1, %s1275_s10   ;;  %p125_p3 = scmp.lt.s32.totalorder %s1283_s12, 0 }
  0x42   : > { %s994_s4 = sshll.u32 %s1782_s30, 4  ;;  %s126_s3 = ssub.s32 0, %s1283_s12 }
  0x43   : > { %s995_s5 = smin.u32 %s1283_s12, %s126_s3  ;;  %p1070_p8 = scmp.eq.s32.totalorder %s1283_s12, 0 }
  0x44   : > { %s128_s27 = sand.u32 1, %s995_s5   ;;  %s1465_s28 = scalar_lea.vmem [#allocation8], %s994_s4 }
  0x45   : > { %s129_s6 = ssub.s32 0, %s128_s27 }
  0x46   : > { %s1821_s6 = smov (!%p125_p3, %s129_s6), %s128_s27 }
  0x47   : > { %p997_p10 = scmp.lt.s32.totalorder %s1821_s6, 0  ;;  %s135_s7 = sadd.s32 2, %s1821_s6 }
  0x49   : > { %s1823_s7 = smov (!%p997_p10, %s135_s7), %s1821_s6 }
  0x4a   : > { %s1783_s8 = sshll.u32 %s1283_s12, 8  ;;  %s1784_s17 = sshll.u32 %s1287_s13, 4 }
  0x4b   : > { %s142_s18 = sshra.s32 %s1783_s8, 7  ;;  %s1029_s21 = sshll.u32 %s1823_s7, 5 }
  0x4c   : > { %s145_s22 = sadd.s32 %s1784_s17, %s142_s18  ;;  %s1479_s27 = scalar_lea.vmem [#allocation2], %s1029_s21 }
  0x4d   : > { %s1001_s25 = sshll.u32 %s145_s22, 6  ;;  %s164_s6 = sshll.u32 %s1479_s27, 4  ;;  %s165_s6 = int_to_ptr.vmem [resolvable:$true] %s164_s6 }
  0x4e   : > { %s147_s3 = scalar_lea.hbm %s1775_s0, %s1001_s25  ;;  %s1302_s8 = smov 64  }
  0x4f   : > { %s1041_s5 = scalar_select %p1070_p8, [#allocation0], [#allocation13] }
  0x50   : > { %1042 = sst [smem:[#allocation10]] (%p1070_p8), %s1302_s8  ;;  %s1303_s18 = smov 128  }
  0x51   : > { %s156_s30 = sld [smem:[%s1041_s5]]   ;;  %s1304_s22 = smov 2  }
  0x52   : > { %1043 = sst [smem:[#allocation10 + $0x1]] (%p1070_p8), %s1303_s18  ;;  %s1305_s25 = smov 512  }
  0x53   : > { %1044 = sst [smem:[#allocation10 + $0x2]] (%p1070_p8), %s1304_s22  ;;  %s1306_s26 = smov 4  }
  0x54   : > { %1045 = sst [smem:[#allocation10 + $0x3]] (%p1070_p8), %s1305_s25  ;;  %s151_s5 = scalar_lea.sflag [#allocation4], %s1823_s7 }
  0x55   : > { %1046 = sst [smem:[#allocation10 + $0x4]] (%p1070_p8), %s1302_s8  ;;  %s1307_s17 = smov [#allocation9]  }
  0x56   : > { %1047 = sst [smem:[#allocation10 + $0x5]] (%p1070_p8), %s1306_s26 }
  0x57   : > { %s1004_s21 = sshll.u32 %s156_s30, 26 }
  0x58   : > { %s1005_s4 = sadd.s32 134217728, %s1004_s21 }
  0x59   : > { %1048 = dma.general (%p1070_p8), %s147_s3, 512, %s165_s6, %s151_s5, %s1307_s17, [#allocation10], %s1005_s4, 0  }
  0x5a   : > { %1263 = dma.done.wait %s151_s5, 512 }
  0x5b   : > { %1264 = vsyncadd %s151_s5, 4294966784  ;;  %s190_s18 = sadd.s32 1, %s1283_s12 }
  0x5c   : > { %p1498_p12 = scmp.lt.s32.totalorder %s190_s18, 2 }
  0x5d   : > { %s195_s30 = ssub.s32 1, %s1823_s7  ;;  %s1801_s8 = sshll.u32 %s1283_s12, 8  ;;  %vm252_vm0 = vcmask 1039360   ;;  %vm271_vm1 = vcmask 1031168   ;;  %vm290_vm2 = vcmask 982016   ;;  %vm309_vm3 = vcmask 973824  }
  0x5e   : > { %s1032_s25 = sadd.s32 256, %s1801_s8  ;;  %s1033_s17 = sshll.u32 %s195_s30, 5  ;;  %vm328_vm4 = vcmask 965632   ;;  %vm518_vm5 = vcmask 392192   ;;  %vm537_vm6 = vcmask 384000   ;;  %vm347_vm7 = vcmask 916480  }
  0x5f   : > { %s197_s21 = sshra.s32 %s1032_s25, 7  ;;  %s1802_s3 = sshll.u32 %s1287_s13, 4  ;;  %vm556_vm8 = vcmask 375808   ;;  %vm366_vm9 = vcmask 908288   ;;  %vm385_vm10 = vcmask 900096   ;;  %vm404_vm11 = vcmask 523264  }
  0x60   : > { %s200_s6 = sadd.s32 %s1802_s3, %s197_s21  ;;  %s205_s20 = scalar_lea.vmem [#allocation2], %s1033_s17  ;;  %vm423_vm12 = vcmask 515072   ;;  %vm442_vm13 = vcmask 506880   ;;  %vm461_vm14 = vcmask 457728   ;;  %vm480_vm15 = vcmask 449536  }
  0x61   : > { %s1011_s26 = sshll.u32 %s200_s6, 6  ;;  %s219_s19 = sshll.u32 %s205_s20, 4  ;;  %s220_s19 = int_to_ptr.vmem [resolvable:$true] %s219_s19 }
  0x62   : > { %s202_s18 = scalar_lea.hbm %s1775_s0, %s1011_s26  ;;  %s1308_s15 = smov 64  }
  0x63   : > { %s1050_s1 = scalar_select %p1498_p12, [#allocation0], [#allocation14] }
  0x64   : > { %1051 = sst [smem:[#allocation12]] (%p1498_p12), %s1308_s15  ;;  %s1309_s8 = smov 128  }
  0x65   : > { %s211_s7 = sld [smem:[%s1050_s1]]   ;;  %s1310_s25 = smov 2  }
  0x66   : > { %1052 = sst [smem:[#allocation12 + $0x1]] (%p1498_p12), %s1309_s8  ;;  %s1311_s21 = smov 512  }
  0x67   : > { %1053 = sst [smem:[#allocation12 + $0x2]] (%p1498_p12), %s1310_s25  ;;  %s1312_s17 = smov 4  }
  0x68   : > { %1054 = sst [smem:[#allocation12 + $0x3]] (%p1498_p12), %s1311_s21  ;;  %s206_s20 = scalar_lea.sflag [#allocation4], %s195_s30 }
  0x69   : > { %1055 = sst [smem:[#allocation12 + $0x4]] (%p1498_p12), %s1308_s15  ;;  %s1313_s6 = smov [#allocation11]  }
  0x6a   : > { %1056 = sst [smem:[#allocation12 + $0x5]] (%p1498_p12), %s1312_s17  ;;  %s1314_s26 = smov 127  }
  0x6b   : > { %s1014_s3 = sshll.u32 %s211_s7, 26  ;;  %s1315_s15 = smov 126  }
  0x6c   : > { %s1015_s1 = sadd.s32 134217728, %s1014_s3  ;;  %s1317_s22 = smov 119  }
  0x6d   : > { %1057 = dma.general (%p1498_p12), %s202_s18, 512, %s220_s19, %s206_s20, %s1313_s6, [#allocation12], %s1015_s1, 0  }
  0x6e   : > { %v1527_v0 = vld [vmem:[%s1479_s27 + $0x8] sm:$0xff]  ;;  %v1530_v1 = vld [vmem:[%s1479_s27] sm:$0xff]  ;;  %v1537_v2 = vld [vmem:[%s1479_s27 + $0x10] sm:$0xff]  ;;  %s1316_s19 = smov 120   ;;  %s1318_s30 = smov 118  }
  0x6f   : > { %248 = vrot.lane.b32.xlu0 %v1527_v0, %s1314_s26  ;;  %246 = vrot.lane.b32.xlu1 %v1530_v1, %s1314_s26  ;;  %s1319_s4 = smov 47   ;;  %s1320_s5 = smov 112   ;;  %v1592_v3 = vld [vmem:[%s1479_s27 + $0x18] sm:$0xff]  ;;  %v1658_v20 = vld [vmem:[#allocation5] sm:$0xff]  ;;  %v1667_v26 = vld [vmem:[#allocation5 + $0x8] sm:$0xff] }
  0x70   : > { %784 = vmatprep.subr.bf16.mxu1 %v1527_v0  ;;  %s1321_s18 = smov 46   ;;  %s1322_s7 = smov 111   ;;  %v1017_v23 = vcombine.high %v1658_v20, %v1658_v20  ;;  %v1019_v27 = vcombine.high %v1667_v26, %v1667_v26 }
  0x71   : > { %785 = vmatpush1.bf16.msra.mxu1 %v1530_v1  ;;  %s1323_s8 = smov 110   ;;  %s1324_s25 = smov 64  }
  0x72   : > { %s1325_s27 = smov 63   ;;  %s1326_s21 = smov 62   ;;  %816 = vmatprep.mubr.bf16.mxu1 %v1017_v23  ;;  %1020 = vmatprep.mubr.msk.bf16.mxu0 %vm518_vm5, %v1019_v27 }
  0x73   : > { %250 = vrot.lane.b32.xlu0 %v1537_v2, %s1314_s26  ;;  %267 = vrot.lane.b32.xlu1 %v1527_v0, %s1315_s15  ;;  %s1327_s3 = smov 56   ;;  %s1328_s17 = smov 55  }
  0x74   : > { %s1329_s1 = smov 54   ;;  %s1330_s20 = smov 48  }
  0x75   : > { %s1022_s6 = sshll.u32 %s1283_s12, 1  ;;  %p1804_p2 = scmp.ne.s32.totalorder %s1791_s23, 0 }
  0x77   : > { %269 = vrot.lane.b32.xlu0 %v1537_v2, %s1315_s15  ;;  %265 = vrot.lane.b32.xlu1 %v1530_v1, %s1315_s15 }
  0x7b   : > { %286 = vrot.lane.b32.xlu0 %v1527_v0, %s1316_s19  ;;  %288 = vrot.lane.b32.xlu1 %v1537_v2, %s1316_s19 }
  0x7f   : > { %284 = vrot.lane.b32.xlu0 %v1530_v1, %s1316_s19  ;;  %305 = vrot.lane.b32.xlu1 %v1527_v0, %s1317_s22 }
  0x83   : > { %307 = vrot.lane.b32.xlu0 %v1537_v2, %s1317_s22  ;;  %303 = vrot.lane.b32.xlu1 %v1530_v1, %s1317_s22 }
  0x87   : > { %324 = vrot.lane.b32.xlu0 %v1527_v0, %s1318_s30  ;;  %326 = vrot.lane.b32.xlu1 %v1537_v2, %s1318_s30 }
  0x8b   : > { %533 = vrot.lane.b32.xlu0 %v1527_v0, %s1319_s4  ;;  %535 = vrot.lane.b32.xlu1 %v1537_v2, %s1319_s4 }
  0x8f   : > { %322 = vrot.lane.b32.xlu0 %v1530_v1, %s1318_s30  ;;  %531 = vrot.lane.b32.xlu1 %v1530_v1, %s1319_s4 }
  0x93   : > { %343 = vrot.lane.b32.xlu0 %v1527_v0, %s1320_s5  ;;  %345 = vrot.lane.b32.xlu1 %v1537_v2, %s1320_s5 }
  0x97   : > { %552 = vrot.lane.b32.xlu0 %v1527_v0, %s1321_s18  ;;  %554 = vrot.lane.b32.xlu1 %v1537_v2, %s1321_s18 }
  0x9b   : > { %341 = vrot.lane.b32.xlu0 %v1530_v1, %s1320_s5  ;;  %550 = vrot.lane.b32.xlu1 %v1530_v1, %s1321_s18 }
  0x9f   : > { %362 = vrot.lane.b32.xlu0 %v1527_v0, %s1322_s7  ;;  %364 = vrot.lane.b32.xlu1 %v1537_v2, %s1322_s7 }
  0xa3   : > { %360 = vrot.lane.b32.xlu0 %v1530_v1, %s1322_s7  ;;  %381 = vrot.lane.b32.xlu1 %v1527_v0, %s1323_s8 }
  0xa7   : > { %383 = vrot.lane.b32.xlu0 %v1537_v2, %s1323_s8  ;;  %575 = vrot.lane.b32.xlu1 %v1537_v2, %s1314_s26 }
  0xab   : > { %577 = vrot.lane.b32.xlu0 %v1592_v3, %s1314_s26  ;;  %379 = vrot.lane.b32.xlu1 %v1530_v1, %s1323_s8 }
  0xaf   : > { %573 = vrot.lane.b32.xlu0 %v1527_v0, %s1314_s26  ;;  %400 = vrot.lane.b32.xlu1 %v1527_v0, %s1324_s25  ;;  %s1023_s26 = sshll.u32 %s1287_s13, 2  ;;  %s1803_s13 = sand.u32 1, %s1275_s10  }
  0xb3   : > { %402 = vrot.lane.b32.xlu0 %v1537_v2, %s1324_s25  ;;  %593 = vrot.lane.b32.xlu1 %v1537_v2, %s1315_s15 }
  0xb7   : > { %595 = vrot.lane.b32.xlu0 %v1592_v3, %s1315_s15  ;;  %398 = vrot.lane.b32.xlu1 %v1530_v1, %s1324_s25 }
  0xbb   : > { %591 = vrot.lane.b32.xlu0 %v1527_v0, %s1315_s15  ;;  %419 = vrot.lane.b32.xlu1 %v1527_v0, %s1325_s27  ;;  %s881_s15 = sadd.s32 %s1023_s26, %s1022_s6 }
  0xbf   : > { %421 = vrot.lane.b32.xlu0 %v1537_v2, %s1325_s27  ;;  %611 = vrot.lane.b32.xlu1 %v1537_v2, %s1316_s19 }
  0xc3   : > { %613 = vrot.lane.b32.xlu0 %v1592_v3, %s1316_s19  ;;  %417 = vrot.lane.b32.xlu1 %v1530_v1, %s1325_s27 }
  0xc7   : > { %609 = vrot.lane.b32.xlu0 %v1527_v0, %s1316_s19  ;;  %438 = vrot.lane.b32.xlu1 %v1527_v0, %s1326_s21  ;;  %s1024_s19 = sshll.u32 %s881_s15, 7 }
  0xc8   : > { %s1718_s12 = scalar_lea.hbm %s1777_s2, %s1024_s19 }
  0xcb   : > { %440 = vrot.lane.b32.xlu0 %v1537_v2, %s1326_s21  ;;  %629 = vrot.lane.b32.xlu1 %v1537_v2, %s1317_s22 }
  0xcf   : > { %631 = vrot.lane.b32.xlu0 %v1592_v3, %s1317_s22  ;;  %436 = vrot.lane.b32.xlu1 %v1530_v1, %s1326_s21 }
  0xd3   : > { %627 = vrot.lane.b32.xlu0 %v1527_v0, %s1317_s22  ;;  %457 = vrot.lane.b32.xlu1 %v1527_v0, %s1327_s3  ;;  %s885_s22 = sshll.u32 %s1465_s28, 4  ;;  %s1720_s22 = int_to_ptr.vmem [resolvable:$true] %s885_s22 }
  0xd4   : > { %s1199_s18 = scalar_lea.vmem %s1720_s22, 256 }
  0xd5   : > { %p1200_p0 = scmp.ne.s32.totalorder %s1720_s22, %s1199_s18 }
  0xd7   : > { %459 = vrot.lane.b32.xlu0 %v1537_v2, %s1327_s3  ;;  %647 = vrot.lane.b32.xlu1 %v1537_v2, %s1318_s30  ;;  %p1201_p5 = pnand %p1200_p0, %p1804_p2 }
  0xd9   : > { %p1202_p6 = pneg %p1201_p5 }
  0xdb   : > { %649 = vrot.lane.b32.xlu0 %v1592_v3, %s1318_s30  ;;  %455 = vrot.lane.b32.xlu1 %v1530_v1, %s1327_s3 }
  0xdf   : > { %645 = vrot.lane.b32.xlu0 %v1527_v0, %s1318_s30  ;;  %476 = vrot.lane.b32.xlu1 %v1527_v0, %s1328_s17 }
  0xe1   : > { %v249_v4 = vpop.permute.xlu0 %248  ;;  %v247_v5 = vpop.permute.xlu1 %246 }
  0xe2   : > { %v253_v9 = vsel %vm252_vm0, %v247_v5, %v249_v4 }
  0xe3   : > { %478 = vrot.lane.b32.xlu0 %v1537_v2, %s1328_s17  ;;  %665 = vrot.lane.b32.xlu1 %v1537_v2, %s1320_s5 }
  0xe5   : > { %v251_v6 = vpop.permute.xlu0 %250  ;;  %v268_v7 = vpop.permute.xlu1 %267 }
  0xe6   : > { %v254_v8 = vsel %vm252_vm0, %v249_v4, %v251_v6 }
  0xe7   : > { %667 = vrot.lane.b32.xlu0 %v1592_v3, %s1320_s5  ;;  %474 = vrot.lane.b32.xlu1 %v1530_v1, %s1328_s17 }
  0xe8   : > { %786 = vmatprep.subr.bf16.mxu1 %v254_v8 }
  0xe9   : > { %787 = vmatpush1.bf16.msra.mxu1 %v253_v9  ;;  %v270_v10 = vpop.permute.xlu0 %269  ;;  %v266_v11 = vpop.permute.xlu1 %265 }
  0xea   : > { %v273_v12 = vsel %vm271_vm1, %v268_v7, %v270_v10  ;;  %v272_v13 = vsel %vm271_vm1, %v266_v11, %v268_v7 }
  0xeb   : > { %663 = vrot.lane.b32.xlu0 %v1527_v0, %s1320_s5  ;;  %495 = vrot.lane.b32.xlu1 %v1527_v0, %s1329_s1  ;;  %s869_s5 = scalar_lea.sflag [#allocation7], %s1803_s13 }
  0xec   : > { %788 = vmatprep.subr.bf16.mxu1 %v273_v12 }
  0xed   : > { %789 = vmatpush1.bf16.msra.mxu1 %v272_v13  ;;  %v287_v14 = vpop.permute.xlu0 %286  ;;  %v289_v15 = vpop.permute.xlu1 %288 }
  0xee   : > { %v292_v16 = vsel %vm290_vm2, %v287_v14, %v289_v15 }
  0xef   : > { %497 = vrot.lane.b32.xlu0 %v1537_v2, %s1329_s1  ;;  %683 = vrot.lane.b32.xlu1 %v1537_v2, %s1322_s7 }
  0xf0   : > { %790 = vmatprep.subr.bf16.mxu1 %v292_v16 }
  0xf1   : > { %v285_v17 = vpop.permute.xlu0 %284  ;;  %v306_v18 = vpop.permute.xlu1 %305 }
  0xf2   : > { %v291_v19 = vsel %vm290_vm2, %v285_v17, %v287_v14 }
  0xf3   : > { %685 = vrot.lane.b32.xlu0 %v1592_v3, %s1322_s7  ;;  %493 = vrot.lane.b32.xlu1 %v1530_v1, %s1329_s1 }
  0xf4   : > { %791 = vmatpush1.bf16.msra.mxu1 %v291_v19 }
  0xf5   : > { %v308_v21 = vpop.permute.xlu0 %307  ;;  %v304_v22 = vpop.permute.xlu1 %303 }
  0xf6   : > { %v311_v24 = vsel %vm309_vm3, %v306_v18, %v308_v21  ;;  %v310_v25 = vsel %vm309_vm3, %v304_v22, %v306_v18 }
  0xf7   : > { %681 = vrot.lane.b32.xlu0 %v1527_v0, %s1322_s7  ;;  %514 = vrot.lane.b32.xlu1 %v1527_v0, %s1330_s20  ;;  %s1331_s7 = smov [#allocation8]  }
  0xf8   : > { %792 = vmatprep.subr.bf16.mxu1 %v311_v24 }
  0xf9   : > { %793 = vmatpush1.bf16.msra.mxu1 %v310_v25  ;;  %v325_v28 = vpop.permute.xlu0 %324  ;;  %v327_v29 = vpop.permute.xlu1 %326 }
  0xfa   : > { %v330_v30 = vsel %vm328_vm4, %v325_v28, %v327_v29 }
  0xfb   : > { %516 = vrot.lane.b32.xlu0 %v1537_v2, %s1330_s20  ;;  %701 = vrot.lane.b32.xlu1 %v1537_v2, %s1323_s8 }
  0xfc   : > { %794 = vmatprep.subr.bf16.mxu1 %v330_v30 }
  0xfd   : > { %v534_v31 = vpop.permute.xlu0 %533  ;;  %v536_v32 = vpop.permute.xlu1 %535 }
  0xfe   : > { %v539_v33 = vsel %vm537_vm6, %v534_v31, %v536_v32 }
  0xff   : > { %703 = vrot.lane.b32.xlu0 %v1592_v3, %s1323_s8  ;;  %512 = vrot.lane.b32.xlu1 %v1530_v1, %s1330_s20 }
 0x100   : > { %825 = vmatprep.subr.bf16.mxu0 %v539_v33 }
 0x101   : > { %v323_v34 = vpop.permute.xlu0 %322  ;;  %v532_v35 = vpop.permute.xlu1 %531 }
 0x102   : > { %v329_v36 = vsel %vm328_vm4, %v323_v34, %v325_v28  ;;  %v538_v37 = vsel %vm537_vm6, %v532_v35, %v534_v31 }
 0x103   : > { %699 = vrot.lane.b32.xlu0 %v1527_v0, %s1323_s8  ;;  %795 = vmatpush1.bf16.msra.mxu1 %v329_v36  ;;  %s1203_s8 = sshll.u32 %s1331_s7, 4  ;;  %s1204_s8 = int_to_ptr.vmem [resolvable:$false] %s1203_s8 }
 0x104   : > { %826 = vmatpush1.bf16.msra.mxu0 %v538_v37  ;;  %s1205_s25 = scalar_lea.vmem %s1204_s8, 512  ;;  %p1206_p7 = scmp.lt.s32.totalorder %s1720_s22, %s1204_s8 }
 0x105   : > { %v344_v38 = vpop.permute.xlu0 %343  ;;  %v346_v39 = vpop.permute.xlu1 %345  ;;  %p1207_p9 = scmp.lt.s32.totalorder %s1205_s25, %s1199_s18 }
 0x106   : > { %v349_v40 = vsel %vm347_vm7, %v344_v38, %v346_v39 }
 0x107   : > { %796 = vmatprep.subr.bf16.mxu1 %v349_v40  ;;  %p1208_p11 = por %p1207_p9, %p1206_p7 }
 0x109   : > { %v553_v41 = vpop.permute.xlu0 %552  ;;  %v555_v42 = vpop.permute.xlu1 %554  ;;  %p1209_p13 = pnand %p1208_p11, %p1202_p6 }
 0x10a   : > { %v558_v43 = vsel %vm556_vm8, %v553_v41, %v555_v42 }
 0x10b   : > { %827 = vmatprep.subr.bf16.mxu0 %v558_v43 }
 0x10d   : > { %v342_v44 = vpop.permute.xlu0 %341  ;;  %v551_v45 = vpop.permute.xlu1 %550 }
 0x10e   : > { %v348_v46 = vsel %vm347_vm7, %v342_v44, %v344_v38  ;;  %v557_v47 = vsel %vm556_vm8, %v551_v45, %v553_v41 }
 0x10f   : > { %797 = vmatpush1.bf16.msra.mxu1 %v348_v46  ;;  %828 = vmatpush1.bf16.msra.mxu0 %v557_v47 }
 0x110   : > { %829 = vmatprep.subr.bf16.mxu0 %v1537_v2 }
 0x111   : > { %v363_v48 = vpop.permute.xlu0 %362  ;;  %v365_v49 = vpop.permute.xlu1 %364 }
 0x112   : > { %v368_v50 = vsel %vm366_vm9, %v363_v48, %v365_v49 }
 0x113   : > { %798 = vmatprep.subr.bf16.mxu1 %v368_v50  ;;  %830 = vmatpush1.bf16.msra.mxu0 %v1527_v0 }
 0x115   : > { %v361_v51 = vpop.permute.xlu0 %360  ;;  %v382_v52 = vpop.permute.xlu1 %381 }
 0x116   : > { %v367_v53 = vsel %vm366_vm9, %v361_v51, %v363_v48 }
 0x117   : > { %799 = vmatpush1.bf16.msra.mxu1 %v367_v53 }
 0x119   : > { %v384_v54 = vpop.permute.xlu0 %383  ;;  %v576_v55 = vpop.permute.xlu1 %575 }
 0x11a   : > { %v387_v56 = vsel %vm385_vm10, %v382_v52, %v384_v54 }
 0x11b   : > { %800 = vmatprep.subr.bf16.mxu1 %v387_v56 }
 0x11d   : > { %v578_v57 = vpop.permute.xlu0 %577  ;;  %v380_v58 = vpop.permute.xlu1 %379 }
 0x11e   : > { %v386_v59 = vsel %vm385_vm10, %v380_v58, %v382_v52  ;;  %v580_v60 = vsel %vm252_vm0, %v576_v55, %v578_v57 }
 0x11f   : > { %801 = vmatpush1.bf16.msra.mxu1 %v386_v59  ;;  %831 = vmatprep.subr.bf16.mxu0 %v580_v60 }
 0x121   : > { %v574_v61 = vpop.permute.xlu0 %573  ;;  %v401_v62 = vpop.permute.xlu1 %400 }
 0x122   : > { %v579_v63 = vsel %vm252_vm0, %v574_v61, %v576_v55  ;;  %vm499_vm0 = vcmask 441344  }
 0x123   : > { %832 = vmatpush1.bf16.msra.mxu0 %v579_v63 }
 0x125   : > { %v403_v0 = vpop.permute.xlu0 %402  ;;  %v594_v1 = vpop.permute.xlu1 %593 }
 0x126   : > { %v406_v2 = vsel %vm404_vm11, %v401_v62, %v403_v0 }
 0x127   : > { %802 = vmatprep.subr.bf16.mxu1 %v406_v2 }
 0x129   : > { %v596_v3 = vpop.permute.xlu0 %595  ;;  %v399_v4 = vpop.permute.xlu1 %398 }
 0x12a   : > { %v405_v5 = vsel %vm404_vm11, %v399_v4, %v401_v62  ;;  %v598_v6 = vsel %vm271_vm1, %v594_v1, %v596_v3 }
 0x12b   : > { %803 = vmatpush1.bf16.msra.mxu1 %v405_v5  ;;  %833 = vmatprep.subr.bf16.mxu0 %v598_v6  ;;  %v1016_v5 = vcombine.low %v1658_v20, %v1658_v20 }
 0x12d   : > { %v592_v7 = vpop.permute.xlu0 %591  ;;  %v420_v8 = vpop.permute.xlu1 %419 }
 0x12e   : > { %v597_v9 = vsel %vm271_vm1, %v592_v7, %v594_v1 }
 0x12f   : > { %834 = vmatpush1.bf16.msra.mxu0 %v597_v9 }
 0x131   : > { %v422_v10 = vpop.permute.xlu0 %421  ;;  %v612_v11 = vpop.permute.xlu1 %611 }
 0x132   : > { %v425_v12 = vsel %vm423_vm12, %v420_v8, %v422_v10 }
 0x133   : > { %804 = vmatprep.subr.bf16.mxu1 %v425_v12 }
 0x135   : > { %v614_v13 = vpop.permute.xlu0 %613  ;;  %v418_v14 = vpop.permute.xlu1 %417 }
 0x136   : > { %v424_v15 = vsel %vm423_vm12, %v418_v14, %v420_v8  ;;  %v616_v16 = vsel %vm290_vm2, %v612_v11, %v614_v13  ;;  %v1018_v8 = vcombine.low %v1667_v26, %v1667_v26 }
 0x137   : > { %805 = vmatpush1.bf16.msra.mxu1 %v424_v15  ;;  %835 = vmatprep.subr.bf16.mxu0 %v616_v16 }
 0x139   : > { %v610_v17 = vpop.permute.xlu0 %609  ;;  %v439_v18 = vpop.permute.xlu1 %438 }
 0x13a   : > { %v615_v19 = vsel %vm290_vm2, %v610_v17, %v612_v11 }
 0x13b   : > { %836 = vmatpush1.bf16.msra.mxu0 %v615_v19 }
 0x13d   : > { %v441_v21 = vpop.permute.xlu0 %440  ;;  %v630_v22 = vpop.permute.xlu1 %629 }
 0x13e   : > { %v444_v23 = vsel %vm442_vm13, %v439_v18, %v441_v21 }
 0x13f   : > { %806 = vmatprep.subr.bf16.mxu1 %v444_v23 }
 0x141   : > { %v632_v24 = vpop.permute.xlu0 %631  ;;  %v437_v25 = vpop.permute.xlu1 %436 }
 0x142   : > { %v443_v27 = vsel %vm442_vm13, %v437_v25, %v439_v18  ;;  %v634_v28 = vsel %vm309_vm3, %v630_v22, %v632_v24 }
 0x143   : > { %807 = vmatpush1.bf16.msra.mxu1 %v443_v27  ;;  %837 = vmatprep.subr.bf16.mxu0 %v634_v28 }
 0x145   : > { %v628_v29 = vpop.permute.xlu0 %627  ;;  %v458_v30 = vpop.permute.xlu1 %457 }
 0x146   : > { %v633_v31 = vsel %vm309_vm3, %v628_v29, %v630_v22 }
 0x147   : > { %838 = vmatpush1.bf16.msra.mxu0 %v633_v31 }
 0x149   : > { %v460_v32 = vpop.permute.xlu0 %459  ;;  %v648_v33 = vpop.permute.xlu1 %647 }
 0x14a   : > { %v463_v34 = vsel %vm461_vm14, %v458_v30, %v460_v32 }
 0x14b   : > { %808 = vmatprep.subr.bf16.mxu1 %v463_v34 }
 0x14d   : > { %v650_v35 = vpop.permute.xlu0 %649  ;;  %v456_v36 = vpop.permute.xlu1 %455 }
 0x14e   : > { %v462_v37 = vsel %vm461_vm14, %v456_v36, %v458_v30  ;;  %v652_v38 = vsel %vm328_vm4, %v648_v33, %v650_v35 }
 0x14f   : > { %809 = vmatpush1.bf16.msra.mxu1 %v462_v37  ;;  %839 = vmatprep.subr.bf16.mxu0 %v652_v38 }
 0x151   : > { %v646_v39 = vpop.permute.xlu0 %645  ;;  %v477_v40 = vpop.permute.xlu1 %476 }
 0x152   : > { %v651_v41 = vsel %vm328_vm4, %v646_v39, %v648_v33 }
 0x153   : > { %840 = vmatpush1.bf16.msra.mxu0 %v651_v41 }
 0x155   : > { %v479_v42 = vpop.permute.xlu0 %478  ;;  %v666_v43 = vpop.permute.xlu1 %665 }
 0x156   : > { %v482_v44 = vsel %vm480_vm15, %v477_v40, %v479_v42 }
 0x157   : > { %810 = vmatprep.subr.bf16.mxu1 %v482_v44 }
 0x159   : > { %v668_v45 = vpop.permute.xlu0 %667  ;;  %v475_v46 = vpop.permute.xlu1 %474 }
 0x15a   : > { %v481_v47 = vsel %vm480_vm15, %v475_v46, %v477_v40  ;;  %v670_v48 = vsel %vm347_vm7, %v666_v43, %v668_v45 }
 0x15b   : > { %811 = vmatpush1.bf16.msra.mxu1 %v481_v47  ;;  %841 = vmatprep.subr.bf16.mxu0 %v670_v48 }
 0x15d   : > { %v664_v49 = vpop.permute.xlu0 %663  ;;  %v496_v50 = vpop.permute.xlu1 %495 }
 0x15e   : > { %v669_v51 = vsel %vm347_vm7, %v664_v49, %v666_v43 }
 0x15f   : > { %842 = vmatpush1.bf16.msra.mxu0 %v669_v51 }
 0x161   : > { %v498_v52 = vpop.permute.xlu0 %497  ;;  %v684_v53 = vpop.permute.xlu1 %683 }
 0x162   : > { %v501_v54 = vsel %vm499_vm0, %v496_v50, %v498_v52 }
 0x163   : > { %812 = vmatprep.subr.bf16.mxu1 %v501_v54 }
 0x165   : > { %v686_v55 = vpop.permute.xlu0 %685  ;;  %v494_v56 = vpop.permute.xlu1 %493 }
 0x166   : > { %v500_v57 = vsel %vm499_vm0, %v494_v56, %v496_v50  ;;  %v688_v58 = vsel %vm366_vm9, %v684_v53, %v686_v55 }
 0x167   : > { %813 = vmatpush1.bf16.msra.mxu1 %v500_v57  ;;  %843 = vmatprep.subr.bf16.mxu0 %v688_v58 }
 0x169   : > { %v682_v59 = vpop.permute.xlu0 %681  ;;  %v515_v60 = vpop.permute.xlu1 %514 }
 0x16a   : > { %v687_v61 = vsel %vm366_vm9, %v682_v59, %v684_v53 }
 0x16b   : > { %844 = vmatpush1.bf16.msra.mxu0 %v687_v61 }
 0x16d   : > { %v517_v62 = vpop.permute.xlu0 %516  ;;  %v702_v63 = vpop.permute.xlu1 %701 }
 0x16e   : > { %v520_v0 = vsel %vm518_vm5, %v515_v60, %v517_v62 }
 0x16f   : > { %814 = vmatprep.subr.bf16.mxu1 %v520_v0 }
 0x171   : > { %v704_v1 = vpop.permute.xlu0 %703  ;;  %v513_v2 = vpop.permute.xlu1 %512 }
 0x172   : > { %v519_v3 = vsel %vm518_vm5, %v513_v2, %v515_v60  ;;  %v706_v4 = vsel %vm385_vm10, %v702_v63, %v704_v1 }
 0x173   : > { %815 = vmatpush1.bf16.msra.mxu1 %v519_v3  ;;  %845 = vmatprep.subr.bf16.mxu0 %v706_v4 }
 0x175   : > { %v700_v6 = vpop.permute.xlu0 %699 }
 0x176   : > { %817 = vmatmul.mubr.bf16.vlgmr.msra.gmra.mrb[0].mxu1 %v1016_v5  ;;  %v705_v7 = vsel %vm385_vm10, %v700_v6, %v702_v63 }
 0x177   : > { %846 = vmatpush1.bf16.msra.mxu0 %v705_v7 }
 0x17a   : > { %858 = vmatmul.mubr.bf16.vlgmr.msra.gmra.mrb[0].mxu0 %v1018_v8 }
 0x249   : > { %v818_v9 = vpop.f32.mrb[0].mxu1 }
 0x24a   : > { %v820_v20 = vpop.f32.mrb[1].mxu1 }
 0x24b   : > { %v822_v10 = vpop.f32.mrb[2].mxu1 }
 0x24c   : > { %v823_v11 = vpop.f32.mrb[3].mxu1 }
 0x24d   : > { %v859_v12 = vpop.f32.mrb[0].mxu0 }
 0x24e   : > { %v860_v13 = vadd.f32 %v859_v12, %v818_v9  ;;  %v861_v14 = vpop.f32.mrb[1].mxu0 }
 0x24f   : > { %v862_v15 = vadd.f32 %v861_v14, %v820_v20  ;;  %v863_v26 = vpop.f32.mrb[2].mxu0 }
 0x250   : > { %866 = vst [vmem:[%s1465_s28] sm:$0xff] %v860_v13  ;;  %v864_v16 = vpop.f32.mrb[3].mxu0 }
 0x251   : > { %867 = vst [vmem:[%s1465_s28 + $0x8] sm:$0xff] %v862_v15 }
 0x252   : > { %1212 = shalt.err (!%p1209_p13)
}
 0x253   : > { %s1213_s28 = scalar_lea.hbm %s1718_s12, 256  ;;  %s1217_s3 = scalar_lea.hbm %s1777_s2, 1024 }
 0x254   : > { %p1214_p1 = scmp.ne.s32.totalorder %s1718_s12, %s1213_s28  ;;  %p1218_p8 = scmp.lt.u32.totalorder %s1718_s12, %s1777_s2 }
 0x255   : > { %p1219_p10 = scmp.lt.u32.totalorder %s1217_s3, %s1213_s28  ;;  %p1221_p0 = scmp.lt.u32.totalorder %s1213_s28, %s1718_s12 }
 0x256   : > { %p1215_p4 = pnand %p1214_p1, %p1804_p2 }
 0x257   : > { %p1220_p12 = por %p1219_p10, %p1218_p8 }
 0x258   : > { %p1216_p3 = pneg %p1215_p4 }
 0x259   : > { %p1222_p5 = por %p1221_p0, %p1220_p12 }
 0x25b   : > { %p1223_p6 = pnand %p1222_p5, %p1216_p3 }
 0x25d   : > { %1226 = shalt.err (!%p1223_p6)
}
 0x25e   : > { %1058 = dma.vmem_to_hbm [thread:$0]  (%p1804_p2), %s1720_s22, 256, %s1718_s12, %s869_s5  }
 0x25f PF: > { %p1072_p7 = scmp.ge.s32.totalorder %s1299_s16, 2  ;;  %s897_s20 = sand.u32 1, %s1271_s9  }
 0x260   : > { %p1805_p9 = scmp.ne.s32.totalorder %s1793_s24, 0  ;;  %s898_s6 = scalar_lea.sflag [#allocation7], %s897_s20 }
 0x262   : > { %p1065_p11 = pnand %p1072_p7, %p1805_p9 }
 0x264   : > { %1266 = dma.done.wait (!%p1065_p11), %s898_s6, 256  }
 0x265   : > { %1268 = vsyncadd (!%p1065_p11), %s898_s6, 4294967040  ;;  %s16_s16 = sadd.s32 1, %s1299_s16   ;;  %s1806_s13 = sld [smem:[#allocation18_spill]] }
 0x266   : > { %p13_p13 = scmp.ge.s32.totalorder %s16_s16, 6   ;;  %s1807_s23 = sld [smem:[#allocation19_spill]] }
 0x267   : > { %s1808_s15 = sld [smem:[#allocation20_spill]]  ;;  %s1809_s9 = smov %s1275_s10 }
 0x268   : > { %s1810_s10 = smov %s1279_s11  ;;  %s1811_s11 = smov %s1426_s29 }
 0x269   : > { %s1812_s12 = smov %s1291_s14  ;;  %15 = sbr.rel (!%p13_p13) target bundleno = 8 (0x8), region = 88 }
 0x26c   : > { %s1813_s14 = smov %s1807_s23 }
 0x270   :  { %903 = vsyncpa [#allocation6], 1 }
 0x271   :  { %905 = vsyncpa [#allocation6 + $0x1], 1 }
 0x272   :  { %906 = vsyncpa [#allocation7], 1 }
 0x273   :  { %908 = vsyncpa [#allocation7 + $0x1], 1 }
 0x274   :  { %909 = vsyncmov [#allocation4] }
 0x277   :  { %s910_s24 = vpop.sfrf %909 }
 0x278   :  { %p1027_p2 = scmp.ne.s32.totalorder %s910_s24, 0 }
 0x27a   :  { %914 = shalt.err (%p1027_p2)  }
 0x27b   :  { %916 = vsyncmov [#allocation4 + $0x1] }
 0x27e   :  { %s917_s29 = vpop.sfrf %916 }
 0x27f   :  { %p1028_p1 = scmp.ne.s32.totalorder %s917_s29, 0 }
 0x281   :  { %921 = shalt.err (%p1028_p1)  }

</bundles_post_ra>
